<compile_context>
chip_gen: v7x
topology: tpu7x:2x2x1
jax: 0.10.0
libtpu: 0.0.40
codegen_flags: <defaults>
</compile_context>

<pallas_src>
import jax
import jax.numpy as jnp
from jax.experimental import pallas as pl
from jax.experimental.pallas import tpu as pltpu


# ----------------------------------------------------------------------------- helpers
def _round_up(n, m):
    return ((n + m - 1) // m) * m


def _pick_batch_tile(B):
    """Batch tile: big enough to amortize per-grid-step overhead (~0.35us), but >=2 grid
    steps for non-tiny batches so v7x's two TensorCores both get work."""
    if B <= 16:
        return _round_up(B, 8)                        # tiny batch: one small tile
    return min(1024, _round_up(pl.cdiv(B, 2), 8))     # >=2 tiles, capped at 1024 rows


# ----------------------------------------------------------------------------- kernel
def policy_kernel(x_ref, w_ref, b_ref, out_ref):
    """Fused PolicyNet forward on one TB-row batch tile.

    x_ref   : (TB, P)   bf16  packed [mask | features_flat | topology_flat | 0-pad]
    w_ref   : (3, P, P) bf16  [block-diag embed | head hidden | head output] (lane-padded)
    b_ref   : (3, 1, P) f32   packed biases
    out_ref : (TB, P)   f32   masked logits (real region [:B, :A])
    """
    x = x_ref[...]

    # Layer 0: the three embedding MLPs fused as ONE block-diagonal matmul (bf16 MXU, f32 acc).
    e = jnp.tanh(jnp.dot(x, w_ref[0], preferred_element_type=jnp.float32) + b_ref[0])
    # Layer 1: head hidden layer (tanh).
    h = jnp.tanh(jnp.dot(e.astype(jnp.bfloat16), w_ref[1],
                         preferred_element_type=jnp.float32) + b_ref[1])
    # Layer 2: output logits.
    logits = jnp.dot(h.astype(jnp.bfloat16), w_ref[2],
                     preferred_element_type=jnp.float32) + b_ref[2]

    # ActionMaskingBlock: the mask occupies lanes [0, A) of x — exactly the logits lanes —
    # so it is read straight from x. Lanes >= A hold feature values / zero pad and are
    # sliced off in the JAX wrapper.
    out_ref[...] = jnp.where(x > 0, logits, jnp.finfo(jnp.float32).min)
    # TODO(synk): on v6e/v7x a bf16 tanh epilogue would halve EUP pressure once DMA-bound;
    # kept f32 here since v5e has no bf16 EUP.


# ----------------------------------------------------------------------------- param packing
def pack_params(params, f1s, f2s, a_dim, H):
    """Pad/pack all weights & biases to lane-dense (P, P) blocks — done ONCE outside the kernel.

    Layer 0 is block-diagonal so one matmul computes all three embeddings. Row blocks follow
    the packed activation layout [mask | features | topology] (mask FIRST so its lanes align
    with the logits lanes); column blocks keep the original hidden-concat order
    [features_embed | topology_embed | mask_embed] so Wh applies unchanged.
    """
    d_in = a_dim + f1s + f2s
    h3 = 3 * H
    P = _round_up(max(d_in, h3, a_dim), 128)

    w0 = jnp.zeros((P, P), jnp.float32)
    w0 = w0.at[0:a_dim, 2 * H:h3].set(params["wm"])
    w0 = w0.at[a_dim:a_dim + f1s, 0:H].set(params["wf"])
    w0 = w0.at[a_dim + f1s:d_in, H:2 * H].set(params["wt"])

    w1 = jnp.zeros((P, P), jnp.float32).at[:h3, :h3].set(params["wh"])
    w2 = jnp.zeros((P, P), jnp.float32).at[:h3, :a_dim].set(params["wo"])

    b0 = jnp.zeros((1, P), jnp.float32)
    b0 = b0.at[:, 0:H].set(params["bf"]).at[:, H:2 * H].set(params["bt"]).at[:, 2 * H:h3].set(params["bm"])
    b1 = jnp.zeros((1, P), jnp.float32).at[:, :h3].set(params["bh"])
    b2 = jnp.zeros((1, P), jnp.float32).at[:, :a_dim].set(params["bo"])

    return {
        "W": jnp.stack([w0, w1, w2]).astype(jnp.bfloat16),   # (3, P, P) bf16
        "B": jnp.stack([b0, b1, b2]),                        # (3, 1, P) f32 epilogue biases
        "P": P,
        "d_in": d_in,
    }


# ----------------------------------------------------------------------------- wrapper
def policy_net_forward(xx, packed):
    """xx: dict with 'features' (B,S,F1), 'topology' (B,S,F2), 'link_to_set_mask' (B,A)."""
    features = xx["features"]
    topology = xx["topology"]
    mask = xx["link_to_set_mask"].astype(jnp.float32)

    B = features.shape[0]
    A = mask.shape[-1]
    P = packed["P"]
    d_in = packed["d_in"]

    # concatenate_stack: cat([x[..., i, :] for i], -1) == reshape(B, S*F).
    feat_flat = features.reshape(B, -1)
    topo_flat = topology.reshape(B, -1)
    # Mask goes FIRST so its lanes coincide with the logits lanes (no separate mask input).
    x = jnp.concatenate([mask, feat_flat, topo_flat], axis=-1).astype(jnp.bfloat16)

    TB = _pick_batch_tile(B)
    B_pad = _round_up(B, TB)

    # Single fused pad to the lane-dense (B_pad, P) slab. Zero rows/lanes are harmless:
    # padded mask lanes are 0 -> float32_min in the output, sliced off below.
    x_p = jnp.pad(x, ((0, B_pad - B), (0, P - d_in)))

    out = pl.pallas_call(
        policy_kernel,
        out_shape=jax.ShapeDtypeStruct((B_pad, P), jnp.float32),
        grid_spec=pltpu.PrefetchScalarGridSpec(
            num_scalar_prefetch=0,
            grid=(B_pad // TB,),
            in_specs=[
                pl.BlockSpec((TB, P), lambda i: (i, 0)),              # activations (+mask)
                pl.BlockSpec((3, P, P), lambda i: (0, 0, 0),
                             pipeline_mode=pl.Buffered(1)),           # packed weights (resident)
                pl.BlockSpec((3, 1, P), lambda i: (0, 0, 0),
                             pipeline_mode=pl.Buffered(1)),           # packed biases  (resident)
            ],
            out_specs=pl.BlockSpec((TB, P), lambda i: (i, 0)),
        ),
        compiler_params=pltpu.CompilerParams(
            dimension_semantics=("parallel",),   # shards batch tiles across TCs (v7x)
        ),
    )(x_p, packed["W"], packed["B"])

    return {"link_to_set": out[:B, :A]}


# ----------------------------------------------------------------------------- params
def normc_init(key, shape, std=1.0):
    """Deterministic normc-style init (columns normalized), weights laid out (in, out)."""
    w = jax.random.normal(key, shape, jnp.float32)
    return w * std / jnp.sqrt(jnp.sum(w * w, axis=0, keepdims=True))


def make_params(key, f1s, f2s, a_dim, H):
    ks = jax.random.split(key, 5)
    return {
        "wf": normc_init(ks[0], (f1s, H)),        "bf": jnp.zeros((1, H), jnp.float32),
        "wt": normc_init(ks[1], (f2s, H)),        "bt": jnp.zeros((1, H), jnp.float32),
        "wm": normc_init(ks[2], (a_dim, H)),      "bm": jnp.zeros((1, H), jnp.float32),
        "wh": normc_init(ks[3], (3 * H, 3 * H)),  "bh": jnp.zeros((1, 3 * H), jnp.float32),
        "wo": normc_init(ks[4], (3 * H, a_dim)),  "bo": jnp.zeros((1, a_dim), jnp.float32),
    }


# ----------------------------------------------------------------------------- reference (f32)
def reference_forward(xx, params):
    feat = xx["features"].reshape(xx["features"].shape[0], -1).astype(jnp.float32)
    topo = xx["topology"].reshape(xx["topology"].shape[0], -1).astype(jnp.float32)
    mask = xx["link_to_set_mask"].astype(jnp.float32)
    f = jnp.tanh(feat @ params["wf"] + params["bf"])
    t = jnp.tanh(topo @ params["wt"] + params["bt"])
    m = jnp.tanh(mask @ params["wm"] + params["bm"])
    hidden = jnp.concatenate([f, t, m], axis=-1)
    h = jnp.tanh(hidden @ params["wh"] + params["bh"])
    logits = h @ params["wo"] + params["bo"]
    return jnp.where(mask > 0, logits, jnp.finfo(jnp.float32).min)


# ----------------------------------------------------------------------------- main
if __name__ == "__main__":
    S, F1, F2 = 2, 16, 12     # feature-stack depth, per-step dims
    H = 32                    # hidden_units = [32]
    A = 24                    # link_to_set action dim == mask dim

    key = jax.random.PRNGKey(0)
    k_par, k_data = jax.random.split(key)
    params = make_params(k_par, S * F1, S * F2, A, H)
    packed = pack_params(params, S * F1, S * F2, A, H)

    def make_inputs(k, B):
        kf, kt, km = jax.random.split(k, 3)
        return {
            "features": jax.random.normal(kf, (B, S, F1), jnp.float32),
            "topology": jax.random.normal(kt, (B, S, F2), jnp.float32),
            "link_to_set_mask": (jax.random.uniform(km, (B, A)) > 0.3).astype(jnp.float32),
        }

    # bf16 weights/activations vs f32 reference -> loosened tolerances (per perf review).
    ATOL = RTOL = 5e-2

    def check(B, fold):
        xx = make_inputs(jax.random.fold_in(k_data, fold), B)
        out = policy_net_forward(xx, packed)
        jax.block_until_ready(out)
        ref = reference_forward(xx, params)
        assert out["link_to_set"].shape == (B, A)
        assert jnp.allclose(out["link_to_set"], ref, atol=ATOL, rtol=RTOL)

    check(2, 0)     # tiny batch: single 8-row tile
    check(192, 1)   # two 96-row tiles (parallel grid, both TCs on v7x)
    check(600, 2)   # two 304-row tiles with padded rows on the last tile

    print("KERNEL_OK")
</pallas_src>

<mosaic_0001>
module attributes {stable_mosaic.version = 11 : i64} {
  func.func @policy_kernel(%arg0: i32, %arg1: memref<8x128xbf16, #tpu.memory_space<vmem>>, %arg2: memref<3x128x128xbf16, #tpu.memory_space<vmem>>, %arg3: memref<3x1x128xf32, #tpu.memory_space<vmem>>, %arg4: memref<8x128xf32, #tpu.memory_space<vmem>>) attributes {dimension_semantics = [#tpu.dimension_semantics<parallel>], iteration_bounds = array<i64: 1>, scalar_prefetch = 0 : i64, scratch_operands = 0 : i64, tpu.core_type = #tpu.core_type<tc>, window_params = [{transform_indices = @transform_0, window_bounds = array<i64: 8, 128>}, {pipeline_mode = #tpu.pipeline_mode<synchronous>, transform_indices = @transform_1, window_bounds = array<i64: 3, 128, 128>}, {pipeline_mode = #tpu.pipeline_mode<synchronous>, transform_indices = @transform_2, window_bounds = array<i64: 3, 1, 128>}, {transform_indices = @transform_3, window_bounds = array<i64: 8, 128>}]} {
    %c0 = arith.constant 0 : index
    %c0_0 = arith.constant 0 : index
    %0 = vector.load %arg1[%c0, %c0_0] : memref<8x128xbf16, #tpu.memory_space<vmem>>, vector<8x128xbf16>
    %c0_1 = arith.constant 0 : index
    %c0_2 = arith.constant 0 : index
    %c0_3 = arith.constant 0 : index
    %1 = vector.load %arg2[%c0_1, %c0_2, %c0_3] : memref<3x128x128xbf16, #tpu.memory_space<vmem>>, vector<1x128x128xbf16>
    %2 = vector.shape_cast %1 : vector<1x128x128xbf16> to vector<128x128xbf16>
    %cst = arith.constant dense<0.000000e+00> : vector<8x128xf32>
    %3 = tpu.matmul %0, %2, %cst {dimension_numbers = #tpu.dot_dimension_numbers<[1], [0], [0], [1], [0, 0, 1, 1], [], []>} : vector<8x128xbf16>, vector<128x128xbf16>, vector<8x128xf32> -> vector<8x128xf32>
    %c0_4 = arith.constant 0 : index
    %c0_5 = arith.constant 0 : index
    %c0_6 = arith.constant 0 : index
    %4 = vector.load %arg3[%c0_4, %c0_5, %c0_6] : memref<3x1x128xf32, #tpu.memory_space<vmem>>, vector<1x1x128xf32>
    %5 = vector.shape_cast %4 : vector<1x1x128xf32> to vector<1x128xf32>
    %6 = vector.broadcast %5 : vector<1x128xf32> to vector<8x128xf32>
    %7 = arith.addf %3, %6 : vector<8x128xf32>
    %8 = math.tanh %7 : vector<8x128xf32>
    %9 = arith.truncf %8 : vector<8x128xf32> to vector<8x128xbf16>
    %c1 = arith.constant 1 : index
    %c0_7 = arith.constant 0 : index
    %c0_8 = arith.constant 0 : index
    %10 = vector.load %arg2[%c1, %c0_7, %c0_8] : memref<3x128x128xbf16, #tpu.memory_space<vmem>>, vector<1x128x128xbf16>
    %11 = vector.shape_cast %10 : vector<1x128x128xbf16> to vector<128x128xbf16>
    %cst_9 = arith.constant dense<0.000000e+00> : vector<8x128xf32>
    %12 = tpu.matmul %9, %11, %cst_9 {dimension_numbers = #tpu.dot_dimension_numbers<[1], [0], [0], [1], [0, 0, 1, 1], [], []>} : vector<8x128xbf16>, vector<128x128xbf16>, vector<8x128xf32> -> vector<8x128xf32>
    %c1_10 = arith.constant 1 : index
    %c0_11 = arith.constant 0 : index
    %c0_12 = arith.constant 0 : index
    %13 = vector.load %arg3[%c1_10, %c0_11, %c0_12] : memref<3x1x128xf32, #tpu.memory_space<vmem>>, vector<1x1x128xf32>
    %14 = vector.shape_cast %13 : vector<1x1x128xf32> to vector<1x128xf32>
    %15 = vector.broadcast %14 : vector<1x128xf32> to vector<8x128xf32>
    %16 = arith.addf %12, %15 : vector<8x128xf32>
    %17 = math.tanh %16 : vector<8x128xf32>
    %18 = arith.truncf %17 : vector<8x128xf32> to vector<8x128xbf16>
    %c2 = arith.constant 2 : index
    %c0_13 = arith.constant 0 : index
    %c0_14 = arith.constant 0 : index
    %19 = vector.load %arg2[%c2, %c0_13, %c0_14] : memref<3x128x128xbf16, #tpu.memory_space<vmem>>, vector<1x128x128xbf16>
    %20 = vector.shape_cast %19 : vector<1x128x128xbf16> to vector<128x128xbf16>
    %cst_15 = arith.constant dense<0.000000e+00> : vector<8x128xf32>
    %21 = tpu.matmul %18, %20, %cst_15 {dimension_numbers = #tpu.dot_dimension_numbers<[1], [0], [0], [1], [0, 0, 1, 1], [], []>} : vector<8x128xbf16>, vector<128x128xbf16>, vector<8x128xf32> -> vector<8x128xf32>
    %c2_16 = arith.constant 2 : index
    %c0_17 = arith.constant 0 : index
    %c0_18 = arith.constant 0 : index
    %22 = vector.load %arg3[%c2_16, %c0_17, %c0_18] : memref<3x1x128xf32, #tpu.memory_space<vmem>>, vector<1x1x128xf32>
    %23 = vector.shape_cast %22 : vector<1x1x128xf32> to vector<1x128xf32>
    %24 = vector.broadcast %23 : vector<1x128xf32> to vector<8x128xf32>
    %25 = arith.addf %21, %24 : vector<8x128xf32>
    %cst_19 = arith.constant 0.000000e+00 : bf16
    %26 = vector.broadcast %cst_19 : bf16 to vector<8x128xbf16>
    %27 = arith.cmpf ogt, %0, %26 : vector<8x128xbf16>
    %cst_20 = arith.constant -3.40282347E+38 : f32
    %28 = vector.broadcast %cst_20 : f32 to vector<8x128xf32>
    %29 = arith.select %27, %25, %28 : vector<8x128xi1>, vector<8x128xf32>
    %c0_21 = arith.constant 0 : index
    %c0_22 = arith.constant 0 : index
    %30 = vector.load %arg4[%c0_21, %c0_22] : memref<8x128xf32, #tpu.memory_space<vmem>>, vector<8x128xf32>
    tpu.vector_store %arg4[%c0_21, %c0_22], %29 {strides = array<i32>} : memref<8x128xf32, #tpu.memory_space<vmem>>, vector<8x128xf32>,
    return
  }
  func.func @transform_0(%arg0: i32) -> (i32, i32) {
    %c0_i32 = arith.constant 0 : i32
    %c0_i32_0 = arith.constant 0 : i32
    return %arg0, %c0_i32 : i32, i32
  }
  func.func @transform_1(%arg0: i32) -> (i32, i32, i32) {
    %c0_i32 = arith.constant 0 : i32
    %c0_i32_0 = arith.constant 0 : i32
    %c0_i32_1 = arith.constant 0 : i32
    %c0_i32_2 = arith.constant 0 : i32
    return %c0_i32, %c0_i32_0, %c0_i32_1 : i32, i32, i32
  }
  func.func @transform_2(%arg0: i32) -> (i32, i32, i32) {
    %c0_i32 = arith.constant 0 : i32
    %c0_i32_0 = arith.constant 0 : i32
    %c0_i32_1 = arith.constant 0 : i32
    %c0_i32_2 = arith.constant 0 : i32
    return %c0_i32, %c0_i32_0, %c0_i32_1 : i32, i32, i32
  }
  func.func @transform_3(%arg0: i32) -> (i32, i32) {
    %c0_i32 = arith.constant 0 : i32
    %c0_i32_0 = arith.constant 0 : i32
    return %arg0, %c0_i32 : i32, i32
  }
}

</mosaic_0001>

<bundles_post_ra>
// kernel: tpu_custom_call.1
= control target key start
LH: loop header
LB: loop body
LE: loop exit
PB: predicated region body
PF: predicated region fallthrough
CT: control target
= control target key end

     0   :  { %8 = vsyncpa [#allocation3], 0  ;;  %s742_s0 = inlined_call_operand.hbm [shape: bf16[8,128], index: 0, kind: input, shape index: {}]   ;;  %s743_s1 = inlined_call_operand.hbm [shape: bf16[3,128,128], index: 1, kind: input, shape index: {}]   ;;  %s744_s2 = inlined_call_operand.vmem [shape: f32[3,1,128], index: 2, kind: input, shape index: {}]   ;;  %s745_s3 = inlined_call_operand.hbm [shape: f32[8,128], index: 3, kind: output, shape index: {}]  }
   0x1   :  { %9 = vsyncpa [#allocation6], 0 }
   0x2   :  { %10 = vsyncpa [#allocation4], 0  ;;  %s632_s12 = smov [#allocation2]   ;;  %s633_s14 = smov [#allocation5]  }
   0x3   :  { %s17_s13 = sshll.u32 %s632_s12, 4  ;;  %s26_s15 = sshll.u32 %s633_s14, 4  ;;  %s18_s13 = int_to_ptr.vmem [resolvable:$true] %s17_s13  ;;  %s660_s15 = int_to_ptr.vmem [resolvable:$true] %s26_s15 }
   0x4   :  { %s560_s18 = scalar_lea.hbm %s742_s0, 64 }
   0x5   :  { %p561_p0 = scmp.ne.s32.totalorder %s742_s0, %s560_s18  ;;  %p564_p1 = scmp.lt.u32.totalorder %s560_s18, %s742_s0 }
   0x7   :  { %p566_p2 = pnand %p564_p1, %p561_p0 }
   0x9   :  { %569 = shalt.err (!%p566_p2)
}
   0xa   :  { %s570_s23 = scalar_lea.vmem %s18_s13, 64  ;;  %p575_p4 = scmp.lt.s32.totalorder %s18_s13, %s18_s13 }
   0xb   :  { %p571_p3 = scmp.ne.s32.totalorder %s18_s13, %s570_s23  ;;  %p576_p5 = scmp.lt.s32.totalorder %s570_s23, %s570_s23 }
   0xd   :  { %p577_p6 = por %p576_p5, %p575_p4 }
   0xf   :  { %p578_p7 = pnand %p577_p6, %p571_p3 }
  0x11   :  { %581 = shalt.err (!%p578_p7)
}
  0x12   :  { %20 = dma.hbm_to_vmem [thread:$0]  %s742_s0, 64, %s18_s13, [#allocation3]  }
  0x13   :  { %s582_s28 = scalar_lea.hbm %s743_s1, 3072 }
  0x14   :  { %p583_p8 = scmp.ne.s32.totalorder %s743_s1, %s582_s28  ;;  %p586_p9 = scmp.lt.u32.totalorder %s582_s28, %s743_s1 }
  0x16   :  { %p588_p10 = pnand %p586_p9, %p583_p8 }
  0x18   :  { %591 = shalt.err (!%p588_p10)
}
  0x19   :  { %s592_s6 = scalar_lea.vmem %s660_s15, 3072  ;;  %p597_p12 = scmp.lt.s32.totalorder %s660_s15, %s660_s15 }
  0x1a   :  { %p593_p11 = scmp.ne.s32.totalorder %s660_s15, %s592_s6  ;;  %p598_p13 = scmp.lt.s32.totalorder %s592_s6, %s592_s6 }
  0x1c   :  { %p599_p0 = por %p598_p13, %p597_p12 }
  0x1e   :  { %p600_p1 = pnand %p599_p0, %p593_p11 }
  0x20   :  { %603 = shalt.err (!%p600_p1)
}
  0x21   :  { %s634_s0 = smov 64   ;;  %s635_s7 = smov 4  }
  0x22   :  { %32 = dma.hbm_to_vmem [thread:$0]  %s743_s1, 3072, %s660_s15, [#allocation6], %s634_s0, %s634_s0, %s635_s7  }
  0x23   :  { %626 = dma.done.wait [#allocation3], 64  }
  0x24   :  { %627 = vsyncadd [#allocation3], 4294967232 }
  0x25   :  { %628 = dma.done.wait [#allocation6], 3072  }
  0x26   :  { %629 = vsyncadd [#allocation6], 4294964224  ;;  %v636_v0 = vmov 0.0   ;;  %vm637_vm0 = vmmov 0   ;;  %v532_v1 = vld [vmem:[#allocation5] sm:$0xff]   ;;  %v533_v2 = vld [vmem:[#allocation5 + $0x8] sm:$0xff]  }
  0x27   :  { %464 = vmatprep.subr.bf16.mxu0 %v636_v0  ;;  %480 = vmatprep.mubr.msk.bf16.mxu0 %vm637_vm0, %v636_v0  ;;  %v534_v3 = vld [vmem:[#allocation5 + $0x10] sm:$0xff]   ;;  %v540_v4 = vld [vmem:[#allocation5 + $0x40] sm:$0xff]   ;;  %v535_v5 = vld [vmem:[#allocation5 + $0x18] sm:$0xff]   ;;  %v638_v42 = vmov 0   ;;  %s639_s15 = smov [#allocation7]  }
  0x28   :  { %484 = vmatprep.subr.bf16.mxu1 %v636_v0  ;;  %500 = vmatprep.mubr.msk.bf16.mxu1 %vm637_vm0, %v636_v0  ;;  %v541_v6 = vld [vmem:[#allocation5 + $0x48] sm:$0xff]   ;;  %v536_v7 = vld [vmem:[#allocation5 + $0x20] sm:$0xff]   ;;  %v542_v8 = vld [vmem:[#allocation5 + $0x50] sm:$0xff]   ;;  %s398_s16 = sshll.u32 %s639_s15, 4  ;;  %s399_s16 = int_to_ptr.vmem [resolvable:$true] %s398_s16 }
  0x29   :  { %465 = vmatpush3.bf16.msra.mxu0 %v532_v1  ;;  %485 = vmatpush3.bf16.msra.mxu1 %v540_v4  ;;  %v537_v9 = vld [vmem:[#allocation5 + $0x28] sm:$0xff]   ;;  %v543_v10 = vld [vmem:[#allocation5 + $0x58] sm:$0xff]   ;;  %v538_v11 = vld [vmem:[#allocation5 + $0x30] sm:$0xff]   ;;  %s604_s17 = scalar_lea.vmem %s399_s16, 128  ;;  %p609_p3 = scmp.lt.s32.totalorder %s399_s16, %s399_s16 }
  0x2a   :  { %466 = vmatprep.subr.bf16.mxu0 %v636_v0  ;;  %486 = vmatprep.subr.bf16.mxu1 %v636_v0  ;;  %v539_v12 = vld [vmem:[#allocation5 + $0x38] sm:$0xff]   ;;  %v544_v14 = vld [vmem:[#allocation5 + $0x60] sm:$0xff]   ;;  %v545_v15 = vld [vmem:[#allocation5 + $0x68] sm:$0xff]   ;;  %p605_p2 = scmp.ne.s32.totalorder %s399_s16, %s604_s17  ;;  %p610_p4 = scmp.lt.s32.totalorder %s604_s17, %s604_s17 }
  0x2b   :  { %v44_v13 = vld [vmem:[#allocation2] sm:$0xf]  ;;  %v546_v16 = vld [vmem:[#allocation5 + $0x70] sm:$0xff]   ;;  %v548_v18 = vld [vmem:[#allocation5 + $0x80] sm:$0xff]  }
  0x2c   :  { %v547_v17 = vld [vmem:[#allocation5 + $0x78] sm:$0xff]   ;;  %v549_v19 = vld [vmem:[#allocation5 + $0x88] sm:$0xff]   ;;  %v550_v20 = vld [vmem:[#allocation5 + $0x90] sm:$0xff]   ;;  %vm386_vm1 = vcmp.gt.bf16.partialorder %v44_v13, 0  ;;  %p611_p5 = por %p610_p4, %p609_p3 }
  0x2d   :  { %467 = vmatpush3.bf16.msra.mxu0 %v533_v2  ;;  %487 = vmatpush3.bf16.msra.mxu1 %v541_v6  ;;  %v551_v21 = vld [vmem:[#allocation5 + $0x98] sm:$0xff]   ;;  %v552_v30 = vld [vmem:[#allocation5 + $0xa0] sm:$0xff]   ;;  %v553_v31 = vld [vmem:[#allocation5 + $0xa8] sm:$0xff]   ;;  %v387_v43 = vsel %vm386_vm1, 65537, %v638_v42 }
  0x2e   :  { %468 = vmatprep.subr.bf16.mxu0 %v636_v0  ;;  %488 = vmatprep.subr.bf16.mxu1 %v636_v0  ;;  %v408_v22 = vld [vmem:[%s744_s2] ss:$0 sm:$0xff]  ;;  %v554_v32 = vld [vmem:[#allocation5 + $0xb0] sm:$0xff]   ;;  %v418_v34 = vld [vmem:[%s744_s2 + $0x1] ss:$0 sm:$0xff]  ;;  %v388_v44 = vunpack.c.l.b16 %v387_v43  ;;  %p612_p6 = pnand %p611_p5, %p605_p2 }
  0x2f   :  { %v555_v33 = vld [vmem:[#allocation5 + $0xb8] sm:$0xff]  }
  0x30   :  { %v428_v45 = vld [vmem:[%s744_s2 + $0x2] ss:$0 sm:$0xff]  ;;  %vm389_vm2 = vcmp.ne.s32.totalorder %v388_v44, 0 }
  0x31   :  { %469 = vmatpush3.bf16.msra.mxu0 %v534_v3  ;;  %489 = vmatpush3.bf16.msra.mxu1 %v542_v8 }
  0x32   :  { %470 = vmatprep.subr.bf16.mxu0 %v636_v0  ;;  %490 = vmatprep.subr.bf16.mxu1 %v636_v0 }
  0x35   :  { %471 = vmatpush3.bf16.msra.mxu0 %v535_v5  ;;  %491 = vmatpush3.bf16.msra.mxu1 %v543_v10 }
  0x36   :  { %472 = vmatprep.subr.bf16.mxu0 %v636_v0  ;;  %492 = vmatprep.subr.bf16.mxu1 %v636_v0 }
  0x39   :  { %473 = vmatpush3.bf16.msra.mxu0 %v536_v7  ;;  %493 = vmatpush3.bf16.msra.mxu1 %v544_v14 }
  0x3a   :  { %474 = vmatprep.subr.bf16.mxu0 %v636_v0  ;;  %494 = vmatprep.subr.bf16.mxu1 %v636_v0 }
  0x3d   :  { %475 = vmatpush3.bf16.msra.mxu0 %v537_v9  ;;  %495 = vmatpush3.bf16.msra.mxu1 %v545_v15 }
  0x3e   :  { %476 = vmatprep.subr.bf16.mxu0 %v636_v0  ;;  %496 = vmatprep.subr.bf16.mxu1 %v636_v0 }
  0x41   :  { %477 = vmatpush3.bf16.msra.mxu0 %v538_v11  ;;  %497 = vmatpush3.bf16.msra.mxu1 %v546_v16 }
  0x42   :  { %478 = vmatprep.subr.bf16.mxu0 %v636_v0  ;;  %498 = vmatprep.subr.bf16.mxu1 %v636_v0 }
  0x45   :  { %479 = vmatpush3.bf16.msra.mxu0 %v539_v12  ;;  %499 = vmatpush3.bf16.msra.mxu1 %v547_v17 }
  0x46   :  { %504 = vmatprep.subr.bf16.mxu0 %v636_v0 }
  0x48   :  { %481 = vmatmul.mubr.bf16.vlgmr.msra.gmra.mrb[0].mxu0 %v44_v13 }
  0x49   :  { %520 = vmatprep.mubr.msk.bf16.mxu0 %vm637_vm0, %v636_v0  ;;  %505 = vmatpush3.bf16.msra.mxu0 %v548_v18 }
  0x4a   :  { %506 = vmatprep.subr.bf16.mxu0 %v636_v0 }
  0x4d   :  { %507 = vmatpush3.bf16.msra.mxu0 %v549_v19 }
  0x4e   :  { %508 = vmatprep.subr.bf16.mxu0 %v636_v0 }
  0x51   :  { %509 = vmatpush3.bf16.msra.mxu0 %v550_v20 }
  0x52   :  { %510 = vmatprep.subr.bf16.mxu0 %v636_v0 }
  0x55   :  { %511 = vmatpush3.bf16.msra.mxu0 %v551_v21 }
  0x56   :  { %512 = vmatprep.subr.bf16.mxu0 %v636_v0 }
  0x59   :  { %513 = vmatpush3.bf16.msra.mxu0 %v552_v30 }
  0x5a   :  { %514 = vmatprep.subr.bf16.mxu0 %v636_v0 }
  0x5d   :  { %515 = vmatpush3.bf16.msra.mxu0 %v553_v31 }
  0x5e   :  { %516 = vmatprep.subr.bf16.mxu0 %v636_v0 }
  0x61   :  { %517 = vmatpush3.bf16.msra.mxu0 %v554_v32 }
  0x62   :  { %518 = vmatprep.subr.bf16.mxu0 %v636_v0 }
  0x65   :  { %519 = vmatpush3.bf16.msra.mxu0 %v555_v33 }
 0x11b   :  { %v150_v23 = vpop.f32.mrb[0].mxu0 }
 0x11c   :  { %v151_v24 = vadd.f32 %v408_v22, %v150_v23  ;;  %v482_v25 = vpop.f32.mrb[1].mxu0 }
 0x11d   :  { %v153_v26 = vpop.f32.mrb[2].mxu0 }
 0x11e   :  { %556 = vtanh.f32 %v151_v24  ;;  %v483_v27 = vpop.f32.mrb[3].mxu0 }
 0x128   :  { %v557_v28 = vpop.eup %556 }
 0x129   :  { %v157_v29 = vpack.c.bf16 %v557_v28, %v557_v28 }
 0x12b   :  { %501 = vmatmul.mubr.bf16.vlgmr.msra.gmra.mrb[0].mxu1 %v157_v29 }
 0x1fe   :  { %v265_v35 = vpop.f32.mrb[0].mxu1 }
 0x1ff   :  { %v266_v36 = vadd.f32 %v418_v34, %v265_v35  ;;  %v502_v37 = vpop.f32.mrb[1].mxu1 }
 0x200   :  { %v268_v38 = vpop.f32.mrb[2].mxu1 }
 0x201   :  { %558 = vtanh.f32 %v266_v36  ;;  %v503_v39 = vpop.f32.mrb[3].mxu1 }
 0x20b   :  { %v559_v40 = vpop.eup %558 }
 0x20c   :  { %v272_v41 = vpack.c.bf16 %v559_v40, %v559_v40 }
 0x20e   :  { %521 = vmatmul.mubr.bf16.vlgmr.msra.gmra.mrb[4].mxu0 %v272_v41 }
 0x2e1   :  { %v380_v46 = vpop.f32.mrb[4].mxu0 }
 0x2e2   :  { %v381_v47 = vadd.f32 %v428_v45, %v380_v46  ;;  %v522_v48 = vpop.f32.mrb[5].mxu0 }
 0x2e3   :  { %v383_v49 = vpop.f32.mrb[6].mxu0 }
 0x2e4   :  { %v390_v50 = vsel %vm389_vm2, %v381_v47, -3.4028235e+38  ;;  %v523_v51 = vpop.f32.mrb[7].mxu0 }
 0x2e5   :  { %391 = vst [vmem:[#allocation7] sm:$0xff] %v390_v50 }
 0x2e6   :  { %615 = shalt.err (!%p612_p6)
}
 0x2e7   :  { %s616_s19 = scalar_lea.hbm %s745_s3, 128 }
 0x2e8   :  { %p617_p7 = scmp.ne.s32.totalorder %s745_s3, %s616_s19  ;;  %p620_p8 = scmp.lt.u32.totalorder %s616_s19, %s745_s3 }
 0x2ea   :  { %p622_p9 = pnand %p620_p8, %p617_p7 }
 0x2ec   :  { %625 = shalt.err (!%p622_p9)
}
 0x2ed   :  { %401 = dma.vmem_to_hbm [thread:$0]  %s399_s16, 128, %s745_s3, [#allocation4]  }
 0x2ee   :  { %630 = dma.done.wait [#allocation4], 128  }
 0x2ef   :  { %631 = vsyncadd [#allocation4], 4294967168 }
 0x2f0   :  { %405 = vsyncpa [#allocation3], 1 }
 0x2f1   :  { %406 = vsyncpa [#allocation6], 1 }
 0x2f2   :  { %407 = vsyncpa [#allocation4], 1 }

</bundles_post_ra>
